<compile_context>
chip_gen: v7x
topology: tpu7x:2x2x1
jax: 0.10.0
libtpu: 0.0.40
codegen_flags: <defaults>
</compile_context>

<pallas_src>
import math

import jax
import jax.numpy as jnp
from jax.experimental import pallas as pl
from jax.experimental.pallas import tpu as pltpu


def _scale_kernel(x_ref, s_ref, o_ref):
    # x_ref / o_ref: (block_rows, L) lane-dense tile in VMEM.
    # s_ref: (1, L) resident per-lane multiplier.
    # Single broadcast multiply -> unmasked full-width stores.
    o_ref[...] = x_ref[...] * s_ref[...]


def _xla_fallback(objects: jax.Array, scale) -> jax.Array:
    # Fused single-HBM-pass XLA expression (used for tiny / ragged inputs).
    return objects.at[:, :, :4].multiply(jnp.asarray(scale, objects.dtype))


def scale_objects_pallas(objects: jax.Array, scale: int = 4, *,
                         block_rows: int | None = None) -> jax.Array:
    """Pallas implementation of ScaleObjects.forward (functional)."""
    b, n, d = objects.shape
    dtype = objects.dtype
    itemsize = jnp.dtype(dtype).itemsize
    total = b * n * d

    # Lane-dense width that is also a multiple of D, so the per-lane scale
    # pattern is row-invariant.  D=6 -> L=384.
    lane = (128 * d) // math.gcd(128, d)

    if total % lane != 0:
        # TODO(synk): ragged (< lane-element) tail — handled via the fused XLA
        # one-liner instead of padding/copying the whole tensor around the
        # kernel (padding costs ~2 extra full HBM passes on a BW-bound op).
        return _xla_fallback(objects, scale)

    rows = total // lane

    # Sublane-pack-aware row alignment: 8 (f32), 16 (bf16/f16), 32 (int8/fp8).
    align = 8 * max(1, 4 // itemsize)

    if block_rows is None:
        # ~4 MiB per input block; double-buffered in + out ≈ 16 MiB of VMEM.
        target_bytes = 4 * 1024 * 1024
        block_rows = max(align, target_bytes // (lane * itemsize))
    block_rows = max(1, min(block_rows, rows))

    if rows <= block_rows:
        if rows >= 2 * align:
            # Split into (at least) 2 blocks so the "parallel" grid axis can
            # shard across v7x's two TensorCores (no effect on v5e/v6e).
            half = -(-rows // 2)
            block_rows = -(-half // align) * align
        else:
            # Single block covering all rows: block dim == full array dim, so
            # it is exempt from the (8, 128) divisibility rule.
            block_rows = rows
    else:
        block_rows = max(align, (block_rows // align) * align)

    grid = pl.cdiv(rows, block_rows)  # ragged last block handled by Pallas

    # Zero-copy: reshape of a contiguous array is a bitcast view.
    x2d = objects.reshape(rows, lane)

    # Per-lane multiplier: `scale` on the first 4 features of each D-group,
    # 1 elsewhere.  Built once in the wrapper (hoisted), broadcast in-kernel.
    lane_idx = jnp.arange(lane, dtype=jnp.int32)
    scale_vec = jnp.where(
        (lane_idx % d) < 4,
        jnp.asarray(scale, dtype),
        jnp.asarray(1, dtype),
    ).reshape(1, lane)

    out2d = pl.pallas_call(
        _scale_kernel,
        out_shape=jax.ShapeDtypeStruct((rows, lane), dtype),
        grid_spec=pltpu.PrefetchScalarGridSpec(
            num_scalar_prefetch=0,
            grid=(grid,),
            in_specs=[
                pl.BlockSpec((block_rows, lane), lambda i: (i, 0)),
                pl.BlockSpec((1, lane), lambda i: (0, 0)),
            ],
            out_specs=pl.BlockSpec((block_rows, lane), lambda i: (i, 0)),
        ),
        compiler_params=pltpu.CompilerParams(
            dimension_semantics=("parallel",),
            # ~4x block (double-buffered in + out) stays well under this on
            # every chip, including v5e's 16 MiB scoped default which this
            # explicitly raises, and v7x's 64 MiB physical VMEM.
            vmem_limit_bytes=32 * 1024 * 1024,
        ),
    )(x2d, scale_vec)

    return out2d.reshape(b, n, d)


def scale_objects(objects: jax.Array, scale: int = 4, *,
                  min_pallas_elements: int = 1 << 20) -> jax.Array:
    """Size-dispatched ScaleObjects: tiny or ragged inputs use the fused XLA
    one-liner (single HBM pass, no launch overhead); large lane-divisible
    inputs use the lane-dense Pallas kernel."""
    b, n, d = objects.shape
    lane = (128 * d) // math.gcd(128, d)
    total = b * n * d
    if total < min_pallas_elements or total % lane != 0:
        return _xla_fallback(objects, scale)
    return scale_objects_pallas(objects, scale)


if __name__ == "__main__":
    key = jax.random.PRNGKey(0)
    k1, k2, k3 = jax.random.split(key, 3)
    scale = 4

    # Divisible, single-block (zero-copy) path: (2, 64, 6) -> rows=2, grid=1.
    a = jax.random.normal(k1, (2, 64, 6), dtype=jnp.float32)
    out_a = jax.block_until_ready(scale_objects_pallas(a, scale))
    ref_a = a.at[:, :, :4].multiply(float(scale))
    assert out_a.shape == a.shape
    assert out_a.dtype == a.dtype
    assert jnp.allclose(out_a, ref_a, atol=1e-6, rtol=1e-6)

    # Divisible, multi-block path with a ragged last block:
    # (2, 576, 6) -> rows=18, block_rows=8 -> grid=3 (last block has 2 rows).
    b = jax.random.normal(k2, (2, 576, 6), dtype=jnp.float32)
    out_b = jax.block_until_ready(scale_objects_pallas(b, scale, block_rows=8))
    ref_b = b.at[:, :, :4].multiply(float(scale))
    assert jnp.allclose(out_b, ref_b, atol=1e-6, rtol=1e-6)

    # Non-divisible / tiny shape: dispatcher uses the fused XLA one-liner
    # (no pad/unpad HBM passes, no kernel-launch overhead).
    c = jax.random.normal(k3, (2, 8, 6), dtype=jnp.float32)
    out_c = jax.block_until_ready(scale_objects(c, scale))
    ref_c = c.at[:, :, :4].multiply(float(scale))
    assert jnp.allclose(out_c, ref_c, atol=1e-6, rtol=1e-6)

    print("KERNEL_OK")
</pallas_src>

<mosaic_0001>
module attributes {stable_mosaic.version = 11 : i64} {
  func.func @_scale_kernel(%arg0: i32, %arg1: memref<2x384xf32, #tpu.memory_space<vmem>>, %arg2: memref<1x384xf32, #tpu.memory_space<vmem>>, %arg3: memref<2x384xf32, #tpu.memory_space<vmem>>) attributes {dimension_semantics = [#tpu.dimension_semantics<parallel>], iteration_bounds = array<i64: 1>, scalar_prefetch = 0 : i64, scratch_operands = 0 : i64, tpu.core_type = #tpu.core_type<tc>, window_params = [{transform_indices = @transform_0, window_bounds = array<i64: 2, 384>}, {pipeline_mode = #tpu.pipeline_mode<synchronous>, transform_indices = @transform_1, window_bounds = array<i64: 1, 384>}, {transform_indices = @transform_2, window_bounds = array<i64: 2, 384>}]} {
    %c0 = arith.constant 0 : index
    %c0_0 = arith.constant 0 : index
    %0 = vector.load %arg1[%c0, %c0_0] : memref<2x384xf32, #tpu.memory_space<vmem>>, vector<2x384xf32>
    %c0_1 = arith.constant 0 : index
    %c0_2 = arith.constant 0 : index
    %1 = vector.load %arg2[%c0_1, %c0_2] : memref<1x384xf32, #tpu.memory_space<vmem>>, vector<1x384xf32>
    %2 = vector.broadcast %1 : vector<1x384xf32> to vector<2x384xf32>
    %3 = arith.mulf %0, %2 : vector<2x384xf32>
    %c0_3 = arith.constant 0 : index
    %c0_4 = arith.constant 0 : index
    %4 = vector.load %arg3[%c0_3, %c0_4] : memref<2x384xf32, #tpu.memory_space<vmem>>, vector<2x384xf32>
    tpu.vector_store %arg3[%c0_3, %c0_4], %3 {strides = array<i32>} : memref<2x384xf32, #tpu.memory_space<vmem>>, vector<2x384xf32>,
    return
  }
  func.func @transform_0(%arg0: i32) -> (i32, i32) {
    %c0_i32 = arith.constant 0 : i32
    %c0_i32_0 = arith.constant 0 : i32
    return %arg0, %c0_i32 : i32, i32
  }
  func.func @transform_1(%arg0: i32) -> (i32, i32) {
    %c0_i32 = arith.constant 0 : i32
    %c0_i32_0 = arith.constant 0 : i32
    %c0_i32_1 = arith.constant 0 : i32
    return %c0_i32, %c0_i32_0 : i32, i32
  }
  func.func @transform_2(%arg0: i32) -> (i32, i32) {
    %c0_i32 = arith.constant 0 : i32
    %c0_i32_0 = arith.constant 0 : i32
    return %arg0, %c0_i32 : i32, i32
  }
}

</mosaic_0001>

<bundles_post_ra>
// kernel: tpu_custom_call.1
= control target key start
LH: loop header
LB: loop body
LE: loop exit
PB: predicated region body
PF: predicated region fallthrough
CT: control target
= control target key end

     0   :  { %7 = vsyncpa [#allocation3], 0  ;;  %s169_s0 = inlined_call_operand.hbm [shape: f32[2,384], index: 0, kind: input, shape index: {}]   ;;  %s170_s1 = inlined_call_operand.vmem [shape: f32[1,384], index: 1, kind: input, shape index: {}]   ;;  %s171_s2 = inlined_call_operand.hbm [shape: f32[2,384], index: 2, kind: output, shape index: {}]  }
   0x1   :  { %8 = vsyncpa [#allocation4], 0  ;;  %s124_s9 = smov [#allocation2]   ;;  %s76_s13 = scalar_lea.hbm %s169_s0, 96 }
   0x2   :  { %s15_s10 = sshll.u32 %s124_s9, 4  ;;  %p77_p0 = scmp.ne.s32.totalorder %s169_s0, %s76_s13  ;;  %s16_s10 = int_to_ptr.vmem [resolvable:$true] %s15_s10 }
   0x3   :  { %p80_p1 = scmp.lt.u32.totalorder %s76_s13, %s169_s0 }
   0x5   :  { %p82_p2 = pnand %p80_p1, %p77_p0 }
   0x7   :  { %85 = shalt.err (!%p82_p2)
}
   0x8   :  { %s86_s18 = scalar_lea.vmem %s16_s10, 96  ;;  %p91_p4 = scmp.lt.s32.totalorder %s16_s10, %s16_s10 }
   0x9   :  { %p87_p3 = scmp.ne.s32.totalorder %s16_s10, %s86_s18  ;;  %p92_p5 = scmp.lt.s32.totalorder %s86_s18, %s86_s18 }
   0xb   :  { %p93_p6 = por %p92_p5, %p91_p4 }
   0xd   :  { %p94_p7 = pnand %p93_p6, %p87_p3 }
   0xf   :  { %97 = shalt.err (!%p94_p7)
}
  0x10   :  { %18 = dma.hbm_to_vmem [thread:$0]  %s169_s0, 96, %s16_s10, [#allocation3]  }
  0x11   :  { %120 = dma.done.wait [#allocation3], 96  }
  0x12   :  { %121 = vsyncadd [#allocation3], 4294967200  ;;  %v27_v0 = vlaneseq  ;;  %v125_v1 = vmov 1983009808   ;;  %v25_v9 = vld [vmem:[%s170_s1] sm:$0x7] }
  0x13   :  { %v41_v2 = vunpack.c.l.s4 %v125_v1  ;;  %v24_v16 = vld [vmem:[#allocation2] sm:$0x3f]  ;;  %s126_s0 = smov [#allocation5]  }
  0x14   :  { %v28_v3 = vshrl.u32 %v27_v0, 7  ;;  %s64_s23 = sshll.u32 %s126_s0, 4  ;;  %s65_s23 = int_to_ptr.vmem [resolvable:$true] %s64_s23 }
  0x15   :  { %v42_v4 = vunpack.c.0.s8 %v41_v2  ;;  %s98_s24 = scalar_lea.vmem %s65_s23, 96  ;;  %p103_p9 = scmp.lt.s32.totalorder %s65_s23, %s65_s23 }
  0x16   :  { %v29_v5 = vsub.s32 0, %v28_v3  ;;  %v33_v6 = vsub.s32 1, %v28_v3  ;;  %v37_v7 = vsub.s32 2, %v28_v3  ;;  %p99_p8 = scmp.ne.s32.totalorder %s65_s23, %s98_s24  ;;  %p104_p10 = scmp.lt.s32.totalorder %s98_s24, %s98_s24 }
  0x17   :  { %v45_v8 = vsub.s32 %v42_v4, %v28_v3 }
  0x18   :  { %v30_v10 = vrot.slane %v25_v9, %v29_v5  ;;  %v34_v11 = vrot.slane %v25_v9, %v33_v6  ;;  %v38_v12 = vrot.slane %v25_v9, %v37_v7  ;;  %p105_p11 = por %p104_p10, %p103_p9 }
  0x1a   :  { %v39_v13 = vcombine.low %v30_v10, %v34_v11  ;;  %v53_v14 = vrot.slane %v38_v12, %v45_v8  ;;  %p106_p12 = pnand %p105_p11, %p99_p8 }
  0x1c   :  { %v46_v15 = vrot.slane %v39_v13, %v45_v8 }
  0x1e   :  { %v54_v17 = vcombine.low %v46_v15, %v53_v14 }
  0x20   :  { %v56_v18 = vmul.f32 %v54_v17, %v24_v16 }
  0x22   :  { %57 = vst [vmem:[#allocation5] sm:$0x3f] %v56_v18 }
  0x23   :  { %109 = shalt.err (!%p106_p12)
}
  0x24   :  { %s110_s26 = scalar_lea.hbm %s171_s2, 96 }
  0x25   :  { %p111_p13 = scmp.ne.s32.totalorder %s171_s2, %s110_s26  ;;  %p114_p0 = scmp.lt.u32.totalorder %s110_s26, %s171_s2 }
  0x27   :  { %p116_p1 = pnand %p114_p0, %p111_p13 }
  0x29   :  { %119 = shalt.err (!%p116_p1)
}
  0x2a   :  { %67 = dma.vmem_to_hbm [thread:$0]  %s65_s23, 96, %s171_s2, [#allocation4]  }
  0x2b   :  { %122 = dma.done.wait [#allocation4], 96  }
  0x2c   :  { %123 = vsyncadd [#allocation4], 4294967200 }
  0x2d   :  { %71 = vsyncpa [#allocation3], 1 }
  0x2e   :  { %72 = vsyncpa [#allocation4], 1 }

</bundles_post_ra>
